<compile_context>
chip_gen: v7x
topology: tpu7x:2x2x1
jax: 0.10.0
libtpu: 0.0.40
codegen_flags: <defaults>
</compile_context>

<pallas_src>
import jax
import jax.numpy as jnp
from jax import lax
from jax.experimental import pallas as pl
from jax.experimental.pallas import tpu as pltpu

ATTEN_EMBED_DIM = 8          # E
ATTEN_UNITS = (64, 32)       # hidden units of DeepModel
SEQ_LEN = 8                  # T
BATCH = 16                   # B (small, but gives a 2-step batch-tiled grid with TB=8)


def asp_kernel(q_ref, k_ref, len_ref,                 # (TB,E), (TM,E), (TM,1) per tile
               wq_ref, wkp_ref, b1_ref, w2_ref, b2_ref, w3_ref, b3_ref,  # resident params
               out_ref):                              # (TB, E) pooled output block
    TB, E = q_ref.shape
    TM = k_ref.shape[0]
    T = TM // TB
    H1 = wq_ref.shape[1]

    q = q_ref[...]                                    # (TB, E)
    k = k_ref[...]                                    # (TM, E)

    # Broadcast query per batch inside VMEM (only needed for the q*k term).
    k3 = k.reshape(TB, T, E)
    qk = (q[:, None, :] * k3).reshape(TM, E)          # (TM, E)

    # concat([q, k, q-k, q*k]) @ W1 folded (host-side) into:
    #   per-row:   [k, q*k] @ [[W1_k - W1_qk], [W1_prod]]   -> single K=2E MXU matmul
    #   per-batch: q @ (W1_q + W1_qk) + b1                  -> tiny (TB,E)x(E,H1) matmul
    x = jnp.concatenate([k, qk], axis=-1)             # (TM, 2E)
    h = jnp.dot(x, wkp_ref[...], preferred_element_type=jnp.float32)                 # (TM, H1)
    qh = jnp.dot(q, wq_ref[...], preferred_element_type=jnp.float32) + b1_ref[...]   # (TB, H1)
    h = (h.reshape(TB, T, H1) + qh[:, None, :]).reshape(TM, H1)
    h = jnp.maximum(h, 0.0)                           # ReLU

    h = jnp.dot(h, w2_ref[...], preferred_element_type=jnp.float32) + b2_ref[...]
    h = jnp.maximum(h, 0.0)                           # ReLU, (TM, H2)

    # deep_out (H2 -> 1): VPU multiply + lane reduction instead of an N=1 MXU matmul.
    s = jnp.sum(h * w3_ref[...], axis=-1, keepdims=True) + b3_ref[...]               # (TM, 1)

    # Mask invalid positions (weight_normalization=False -> pad with zeros).
    t_ids = lax.broadcasted_iota(jnp.int32, (TM, 1), 0) % T
    scores = jnp.where(t_ids < len_ref[...], s, 0.0)                                 # (TM, 1)

    # Pooling: per-batch segment reduction (O(B*T*E), VPU/XLU only).
    pooled = (scores * k).reshape(TB, T, E).sum(axis=1)                              # (TB, E)
    out_ref[...] = pooled.astype(out_ref.dtype)


def attention_sequence_pooling(query, keys, keys_len, params, batches_per_tile=8):
    """query (B,1,E), keys (B,T,E), keys_len (B,1) int -> (B,1,E)."""
    B, T, E = keys.shape
    w1, b1, w2, b2, w3, b3 = params
    H1, H2 = w1.shape[1], w2.shape[1]
    R = B * T

    # Batch-tile size: multiple of 8 (sublane alignment) or fall back to the whole batch.
    tb = batches_per_tile if (B % batches_per_tile == 0 and batches_per_tile % 8 == 0) else B
    tm = tb * T
    n_tiles = B // tb

    # Host-side, once: fold the 4-way concat into pre-combined W1 blocks (algebraically exact):
    #   concat([q,k,q-k,q*k]) @ W1 == q @ (W1a+W1c) + [k, q*k] @ [[W1b-W1c],[W1d]]
    wq = w1[0 * E:1 * E] + w1[2 * E:3 * E]                               # (E, H1)
    wkp = jnp.concatenate([w1[1 * E:2 * E] - w1[2 * E:3 * E],
                           w1[3 * E:4 * E]], axis=0)                     # (2E, H1)
    w3row = w3.reshape(1, H2)                                            # (1, H2)

    q2 = query.reshape(B, E)                                             # no T-duplication
    k_rows = keys.reshape(R, E)
    len_rows = jnp.broadcast_to(keys_len.reshape(B, 1).astype(jnp.int32),
                                (B, T)).reshape(R, 1)                    # tiny int32 column

    # Advisory cost estimate so XLA can overlap this kernel with surrounding ops.
    flops = (R * (2 * (2 * E) * H1 + 2 * H1 * H2 + 2 * H2)
             + B * (2 * E * H1 + 2 * T * E))
    bytes_accessed = 4 * (B * E + R * E + R
                          + 3 * E * H1 + H1 + H1 * H2 + H2 + H2 + 1
                          + B * E)

    grid_spec = pltpu.PrefetchScalarGridSpec(
        num_scalar_prefetch=0,
        grid=(n_tiles,),
        in_specs=[
            pl.BlockSpec((tb, E), lambda i: (i, 0)),     # query (per batch)
            pl.BlockSpec((tm, E), lambda i: (i, 0)),     # key rows
            pl.BlockSpec((tm, 1), lambda i: (i, 0)),     # per-row valid length
            pl.BlockSpec(wq.shape, lambda i: (0, 0)),    # resident MLP params
            pl.BlockSpec(wkp.shape, lambda i: (0, 0)),
            pl.BlockSpec(b1.shape, lambda i: (0, 0)),
            pl.BlockSpec(w2.shape, lambda i: (0, 0)),
            pl.BlockSpec(b2.shape, lambda i: (0, 0)),
            pl.BlockSpec(w3row.shape, lambda i: (0, 0)),
            pl.BlockSpec(b3.shape, lambda i: (0, 0)),
        ],
        out_specs=pl.BlockSpec((tb, E), lambda i: (i, 0)),
    )

    out = pl.pallas_call(
        asp_kernel,
        out_shape=jax.ShapeDtypeStruct((B, E), jnp.float32),
        grid_spec=grid_spec,
        compiler_params=pltpu.CompilerParams(
            # Tiles are whole batches writing disjoint output blocks -> safe to shard across
            # the two v7x TensorCores; neutral on single-TC v5e/v6e.
            dimension_semantics=("parallel",)),
        cost_estimate=pl.CostEstimate(flops=flops, transcendentals=0,
                                      bytes_accessed=bytes_accessed),
    )(q2, k_rows, len_rows, wq, wkp, b1, w2, b2, w3row, b3)

    return out.reshape(B, 1, E)


def init_params(key, embed_dim=ATTEN_EMBED_DIM, units=ATTEN_UNITS):
    """Deterministic synthetic MLP params (DeepModel: 4E->64->32, deep_out: 32->1)."""
    k1, k2, k3 = jax.random.split(key, 3)
    in_dim = 4 * embed_dim
    w1 = jax.random.normal(k1, (in_dim, units[0]), jnp.float32) * 0.1
    b1 = jnp.zeros((1, units[0]), jnp.float32)
    w2 = jax.random.normal(k2, (units[0], units[1]), jnp.float32) * 0.1
    b2 = jnp.zeros((1, units[1]), jnp.float32)
    w3 = jax.random.normal(k3, (units[1], 1), jnp.float32) * 0.1
    b3 = jnp.zeros((1, 1), jnp.float32)
    return (w1, b1, w2, b2, w3, b3)


def reference_forward(query, keys, keys_len, params):
    """Pure-JAX reference matching the PyTorch module (use_bn=False, no weight_norm)."""
    w1, b1, w2, b2, w3, b3 = params
    B, T, E = keys.shape
    q = jnp.broadcast_to(query, (B, T, E))
    x = jnp.concatenate([q, keys, q - keys, q * keys], axis=-1)
    h = jnp.maximum(x @ w1 + b1, 0.0)
    h = jnp.maximum(h @ w2 + b2, 0.0)
    s = h @ w3 + b3                                   # (B, T, 1)
    s = jnp.transpose(s, (0, 2, 1))                   # (B, 1, T)
    mask = jnp.arange(T)[None, :] < keys_len.reshape(-1, 1)
    scores = jnp.where(mask[:, None, :], s, 0.0)      # (B, 1, T)
    return scores @ keys                              # (B, 1, E)


if __name__ == "__main__":
    key = jax.random.PRNGKey(0)
    kq, kk, kp = jax.random.split(key, 3)

    query = jax.random.normal(kq, (BATCH, 1, ATTEN_EMBED_DIM), jnp.float32)
    keys = jax.random.normal(kk, (BATCH, SEQ_LEN, ATTEN_EMBED_DIM), jnp.float32)
    keys_len = ((jnp.arange(BATCH) % SEQ_LEN) + 1).astype(jnp.int32).reshape(BATCH, 1)

    params = init_params(kp)

    out = attention_sequence_pooling(query, keys, keys_len, params)
    out = jax.block_until_ready(out)

    ref = reference_forward(query, keys, keys_len, params)
    assert out.shape == (BATCH, 1, ATTEN_EMBED_DIM)
    assert jnp.allclose(out, ref, atol=1e-4, rtol=1e-4)

    print("KERNEL_OK")
</pallas_src>

<mosaic_0001>
module attributes {stable_mosaic.version = 11 : i64} {
  func.func @asp_kernel(%arg0: i32, %arg1: memref<8x8xf32, #tpu.memory_space<vmem>>, %arg2: memref<64x8xf32, #tpu.memory_space<vmem>>, %arg3: memref<64x1xi32, #tpu.memory_space<vmem>>, %arg4: memref<8x64xf32, #tpu.memory_space<vmem>>, %arg5: memref<16x64xf32, #tpu.memory_space<vmem>>, %arg6: memref<1x64xf32, #tpu.memory_space<vmem>>, %arg7: memref<64x32xf32, #tpu.memory_space<vmem>>, %arg8: memref<1x32xf32, #tpu.memory_space<vmem>>, %arg9: memref<1x32xf32, #tpu.memory_space<vmem>>, %arg10: memref<1x1xf32, #tpu.memory_space<vmem>>, %arg11: memref<8x8xf32, #tpu.memory_space<vmem>>) attributes {dimension_semantics = [#tpu.dimension_semantics<parallel>], iteration_bounds = array<i64: 2>, scalar_prefetch = 0 : i64, scratch_operands = 0 : i64, tpu.core_type = #tpu.core_type<tc>, window_params = [{transform_indices = @transform_0, window_bounds = array<i64: 8, 8>}, {transform_indices = @transform_1, window_bounds = array<i64: 64, 8>}, {transform_indices = @transform_2, window_bounds = array<i64: 64, 1>}, {pipeline_mode = #tpu.pipeline_mode<synchronous>, transform_indices = @transform_3, window_bounds = array<i64: 8, 64>}, {pipeline_mode = #tpu.pipeline_mode<synchronous>, transform_indices = @transform_4, window_bounds = array<i64: 16, 64>}, {pipeline_mode = #tpu.pipeline_mode<synchronous>, transform_indices = @transform_5, window_bounds = array<i64: 1, 64>}, {pipeline_mode = #tpu.pipeline_mode<synchronous>, transform_indices = @transform_6, window_bounds = array<i64: 64, 32>}, {pipeline_mode = #tpu.pipeline_mode<synchronous>, transform_indices = @transform_7, window_bounds = array<i64: 1, 32>}, {pipeline_mode = #tpu.pipeline_mode<synchronous>, transform_indices = @transform_8, window_bounds = array<i64: 1, 32>}, {pipeline_mode = #tpu.pipeline_mode<synchronous>, transform_indices = @transform_9, window_bounds = array<i64: 1, 1>}, {transform_indices = @transform_10, window_bounds = array<i64: 8, 8>}]} {
    %c0 = arith.constant 0 : index
    %c0_0 = arith.constant 0 : index
    %0 = vector.load %arg1[%c0, %c0_0] : memref<8x8xf32, #tpu.memory_space<vmem>>, vector<8x8xf32>
    %c0_1 = arith.constant 0 : index
    %c0_2 = arith.constant 0 : index
    %1 = vector.load %arg2[%c0_1, %c0_2] : memref<64x8xf32, #tpu.memory_space<vmem>>, vector<64x8xf32>
    %2 = vector.shape_cast %1 : vector<64x8xf32> to vector<8x8x8xf32>
    %3 = vector.shape_cast %0 : vector<8x8xf32> to vector<8x1x8xf32>
    %4 = vector.broadcast %3 : vector<8x1x8xf32> to vector<8x8x8xf32>
    %5 = arith.mulf %4, %2 : vector<8x8x8xf32>
    %6 = vector.shape_cast %5 : vector<8x8x8xf32> to vector<64x8xf32>
    %7 = tpu.concatenate %1, %6 in 1 : vector<64x8xf32>, vector<64x8xf32> -> vector<64x16xf32>
    %c0_3 = arith.constant 0 : index
    %c0_4 = arith.constant 0 : index
    %8 = vector.load %arg5[%c0_3, %c0_4] : memref<16x64xf32, #tpu.memory_space<vmem>>, vector<16x64xf32>
    %cst = arith.constant dense<0.000000e+00> : vector<64x64xf32>
    %9 = tpu.matmul %7, %8, %cst {dimension_numbers = #tpu.dot_dimension_numbers<[1], [0], [0], [1], [0, 0, 1, 1], [], []>} : vector<64x16xf32>, vector<16x64xf32>, vector<64x64xf32> -> vector<64x64xf32>
    %c0_5 = arith.constant 0 : index
    %c0_6 = arith.constant 0 : index
    %10 = vector.load %arg4[%c0_5, %c0_6] : memref<8x64xf32, #tpu.memory_space<vmem>>, vector<8x64xf32>
    %cst_7 = arith.constant dense<0.000000e+00> : vector<8x64xf32>
    %11 = tpu.matmul %0, %10, %cst_7 {dimension_numbers = #tpu.dot_dimension_numbers<[1], [0], [0], [1], [0, 0, 1, 1], [], []>} : vector<8x8xf32>, vector<8x64xf32>, vector<8x64xf32> -> vector<8x64xf32>
    %c0_8 = arith.constant 0 : index
    %c0_9 = arith.constant 0 : index
    %12 = vector.load %arg6[%c0_8, %c0_9] : memref<1x64xf32, #tpu.memory_space<vmem>>, vector<1x64xf32>
    %13 = vector.broadcast %12 : vector<1x64xf32> to vector<8x64xf32>
    %14 = arith.addf %11, %13 : vector<8x64xf32>
    %15 = vector.shape_cast %9 : vector<64x64xf32> to vector<8x8x64xf32>
    %16 = vector.shape_cast %14 : vector<8x64xf32> to vector<8x1x64xf32>
    %17 = vector.broadcast %16 : vector<8x1x64xf32> to vector<8x8x64xf32>
    %18 = arith.addf %15, %17 : vector<8x8x64xf32>
    %19 = vector.shape_cast %18 : vector<8x8x64xf32> to vector<64x64xf32>
    %cst_10 = arith.constant 0.000000e+00 : f32
    %20 = vector.broadcast %cst_10 : f32 to vector<64x64xf32>
    %21 = arith.maximumf %19, %20 : vector<64x64xf32>
    %c0_11 = arith.constant 0 : index
    %c0_12 = arith.constant 0 : index
    %22 = vector.load %arg7[%c0_11, %c0_12] : memref<64x32xf32, #tpu.memory_space<vmem>>, vector<64x32xf32>
    %cst_13 = arith.constant dense<0.000000e+00> : vector<64x32xf32>
    %23 = tpu.matmul %21, %22, %cst_13 {dimension_numbers = #tpu.dot_dimension_numbers<[1], [0], [0], [1], [0, 0, 1, 1], [], []>} : vector<64x64xf32>, vector<64x32xf32>, vector<64x32xf32> -> vector<64x32xf32>
    %c0_14 = arith.constant 0 : index
    %c0_15 = arith.constant 0 : index
    %24 = vector.load %arg8[%c0_14, %c0_15] : memref<1x32xf32, #tpu.memory_space<vmem>>, vector<1x32xf32>
    %25 = vector.broadcast %24 : vector<1x32xf32> to vector<64x32xf32>
    %26 = arith.addf %23, %25 : vector<64x32xf32>
    %cst_16 = arith.constant 0.000000e+00 : f32
    %27 = vector.broadcast %cst_16 : f32 to vector<64x32xf32>
    %28 = arith.maximumf %26, %27 : vector<64x32xf32>
    %c0_17 = arith.constant 0 : index
    %c0_18 = arith.constant 0 : index
    %29 = vector.load %arg9[%c0_17, %c0_18] : memref<1x32xf32, #tpu.memory_space<vmem>>, vector<1x32xf32>
    %30 = vector.broadcast %29 : vector<1x32xf32> to vector<64x32xf32>
    %31 = arith.mulf %28, %30 : vector<64x32xf32>
    %cst_19 = arith.constant dense<0.000000e+00> : vector<64xf32>
    %32 = vector.multi_reduction <add>, %31, %cst_19 [1] : vector<64x32xf32> to vector<64xf32>
    %33 = vector.shape_cast %32 : vector<64xf32> to vector<64x1xf32>
    %c0_20 = arith.constant 0 : index
    %c0_21 = arith.constant 0 : index
    %34 = vector.load %arg10[%c0_20, %c0_21] : memref<1x1xf32, #tpu.memory_space<vmem>>, vector<1x1xf32>
    %35 = vector.broadcast %34 : vector<1x1xf32> to vector<64x1xf32>
    %36 = arith.addf %33, %35 : vector<64x1xf32>
    %37 = tpu.iota {dimensions = array<i32: 0>} : vector<64x1xi32>
    %c8_i32 = arith.constant 8 : i32
    %c0_i32 = arith.constant 0 : i32
    %38 = arith.cmpi eq, %c8_i32, %c0_i32 : i32
    %c1_i32 = arith.constant 1 : i32
    %39 = arith.select %38, %c1_i32, %c8_i32 : i32
    %40 = vector.broadcast %39 : i32 to vector<64x1xi32>
    %41 = arith.remsi %37, %40 : vector<64x1xi32>
    %c0_i32_22 = arith.constant 0 : i32
    %42 = vector.broadcast %c0_i32_22 : i32 to vector<64x1xi32>
    %43 = arith.cmpi ne, %41, %42 : vector<64x1xi32>
    %c0_i32_23 = arith.constant 0 : i32
    %44 = vector.broadcast %c0_i32_23 : i32 to vector<64x1xi32>
    %45 = arith.cmpi slt, %41, %44 : vector<64x1xi32>
    %c0_i32_24 = arith.constant 0 : i32
    %46 = arith.cmpi slt, %39, %c0_i32_24 : i32
    %47 = vector.broadcast %46 : i1 to vector<64x1xi1>
    %48 = vector.broadcast %47 : vector<64x1xi1> to vector<64x1xi1>
    %49 = arith.xori %45, %48 : vector<64x1xi1>
    %50 = arith.andi %49, %43 : vector<64x1xi1>
    %51 = vector.broadcast %39 : i32 to vector<64x1xi32>
    %52 = arith.addi %41, %51 : vector<64x1xi32>
    %53 = arith.select %50, %52, %41 : vector<64x1xi1>, vector<64x1xi32>
    %c0_25 = arith.constant 0 : index
    %c0_26 = arith.constant 0 : index
    %54 = vector.load %arg3[%c0_25, %c0_26] : memref<64x1xi32, #tpu.memory_space<vmem>>, vector<64x1xi32>
    %55 = arith.cmpi slt, %53, %54 : vector<64x1xi32>
    %cst_27 = arith.constant 0.000000e+00 : f32
    %56 = vector.broadcast %cst_27 : f32 to vector<64x1xf32>
    %57 = arith.select %55, %36, %56 : vector<64x1xi1>, vector<64x1xf32>
    %58 = vector.broadcast %57 : vector<64x1xf32> to vector<64x8xf32>
    %59 = arith.mulf %58, %1 : vector<64x8xf32>
    %60 = vector.shape_cast %59 : vector<64x8xf32> to vector<8x8x8xf32>
    %cst_28 = arith.constant dense<0.000000e+00> : vector<8x8xf32>
    %61 = vector.multi_reduction <add>, %60, %cst_28 [1] : vector<8x8x8xf32> to vector<8x8xf32>
    %c0_29 = arith.constant 0 : index
    %c0_30 = arith.constant 0 : index
    %62 = vector.load %arg11[%c0_29, %c0_30] : memref<8x8xf32, #tpu.memory_space<vmem>>, vector<8x8xf32>
    tpu.vector_store %arg11[%c0_29, %c0_30], %61 {strides = array<i32>} : memref<8x8xf32, #tpu.memory_space<vmem>>, vector<8x8xf32>,
    return
  }
  func.func @transform_0(%arg0: i32) -> (i32, i32) {
    %c0_i32 = arith.constant 0 : i32
    %c0_i32_0 = arith.constant 0 : i32
    return %arg0, %c0_i32 : i32, i32
  }
  func.func @transform_1(%arg0: i32) -> (i32, i32) {
    %c0_i32 = arith.constant 0 : i32
    %c0_i32_0 = arith.constant 0 : i32
    return %arg0, %c0_i32 : i32, i32
  }
  func.func @transform_2(%arg0: i32) -> (i32, i32) {
    %c0_i32 = arith.constant 0 : i32
    %c0_i32_0 = arith.constant 0 : i32
    return %arg0, %c0_i32 : i32, i32
  }
  func.func @transform_3(%arg0: i32) -> (i32, i32) {
    %c0_i32 = arith.constant 0 : i32
    %c0_i32_0 = arith.constant 0 : i32
    %c0_i32_1 = arith.constant 0 : i32
    return %c0_i32, %c0_i32_0 : i32, i32
  }
  func.func @transform_4(%arg0: i32) -> (i32, i32) {
    %c0_i32 = arith.constant 0 : i32
    %c0_i32_0 = arith.constant 0 : i32
    %c0_i32_1 = arith.constant 0 : i32
    return %c0_i32, %c0_i32_0 : i32, i32
  }
  func.func @transform_5(%arg0: i32) -> (i32, i32) {
    %c0_i32 = arith.constant 0 : i32
    %c0_i32_0 = arith.constant 0 : i32
    %c0_i32_1 = arith.constant 0 : i32
    return %c0_i32, %c0_i32_0 : i32, i32
  }
  func.func @transform_6(%arg0: i32) -> (i32, i32) {
    %c0_i32 = arith.constant 0 : i32
    %c0_i32_0 = arith.constant 0 : i32
    %c0_i32_1 = arith.constant 0 : i32
    return %c0_i32, %c0_i32_0 : i32, i32
  }
  func.func @transform_7(%arg0: i32) -> (i32, i32) {
    %c0_i32 = arith.constant 0 : i32
    %c0_i32_0 = arith.constant 0 : i32
    %c0_i32_1 = arith.constant 0 : i32
    return %c0_i32, %c0_i32_0 : i32, i32
  }
  func.func @transform_8(%arg0: i32) -> (i32, i32) {
    %c0_i32 = arith.constant 0 : i32
    %c0_i32_0 = arith.constant 0 : i32
    %c0_i32_1 = arith.constant 0 : i32
    return %c0_i32, %c0_i32_0 : i32, i32
  }
  func.func @transform_9(%arg0: i32) -> (i32, i32) {
    %c0_i32 = arith.constant 0 : i32
    %c0_i32_0 = arith.constant 0 : i32
    %c0_i32_1 = arith.constant 0 : i32
    return %c0_i32, %c0_i32_0 : i32, i32
  }
  func.func @transform_10(%arg0: i32) -> (i32, i32) {
    %c0_i32 = arith.constant 0 : i32
    %c0_i32_0 = arith.constant 0 : i32
    return %arg0, %c0_i32 : i32, i32
  }
}

</mosaic_0001>

<bundles_post_ra>
// kernel: tpu_custom_call.1
= control target key start
LH: loop header
LB: loop body
LE: loop exit
PB: predicated region body
PF: predicated region fallthrough
CT: control target
= control target key end

     0   :  { %s1635_s15 = smov 0   ;;  %s1860_s0 = inlined_call_operand.vmem [shape: f32[16,8], index: 0, kind: input, shape index: {}]   ;;  %s1861_s1 = inlined_call_operand.vmem [shape: f32[128,8], index: 1, kind: input, shape index: {}]   ;;  %s1862_s2 = inlined_call_operand.vmem [shape: s32[128,1], index: 2, kind: input, shape index: {}]   ;;  %s1863_s3 = inlined_call_operand.vmem [shape: f32[8,64], index: 3, kind: input, shape index: {}]   ;;  %s1864_s4 = inlined_call_operand.vmem [shape: f32[16,64], index: 4, kind: input, shape index: {}]   ;;  %s1865_s5 = inlined_call_operand.vmem [shape: f32[1,64], index: 5, kind: input, shape index: {}]   ;;  %s1866_s6 = inlined_call_operand.vmem [shape: f32[64,32], index: 6, kind: input, shape index: {}]   ;;  %s1867_s7 = inlined_call_operand.vmem [shape: f32[1,32], index: 7, kind: input, shape index: {}]   ;;  %s1868_s8 = inlined_call_operand.vmem [shape: f32[1,32], index: 8, kind: input, shape index: {}]   ;;  %s1869_s9 = inlined_call_operand.<no memory space> [shape: f32[1,1], index: 9, kind: input, shape index: {}]   ;;  %s1870_s10 = inlined_call_operand.vmem [shape: f32[16,8], index: 10, kind: output, shape index: {}]  }
   0x1   :  { %v15_v0 = vstv %s1869_s9 }
   0x2   :  { %16 = vst [vmem:[#allocation2] sm:$0x1] %v15_v0 }
   0x3 LB: > { %s1409_s16 = sadd.s32 4294967295, %s1570_s15   ;;  %p1413_p0 = scmp.ge.s32.totalorder %s1570_s15, 1  ;;  %s1570_s15 = sphi %s1635_s15, %s22_s15  }
   0x4   : > { %p335_p1 = scmp.lt.s32.totalorder %s1570_s15, 3 }
   0x6   : > { %p336_p2 = pnand %p1413_p0, %p335_p1 }
   0x7   : > { %p381_p3 = scmp.lt.s32.totalorder (!%p336_p2), %s1409_s16, 1  ;;  %s1415_s17 = sshll.u32 (!%p336_p2), %s1409_s16, 3  ;;  %v415_v1 = vlaneseq (!%p336_p2)  ;;  %v681_v2 = vld [vmem:[%s1863_s3] sm:$0xff] (!%p336_p2)  ;;  %v1572_v3 = vmov (!%p336_p2), 1966171168   ;;  %v1573_v5 = vmov (!%p336_p2), 0.0  }
   0x8   : > { %339 = sbr.rel (%p336_p2) target bundleno = 899 (0x383), region = 60  ;;  %p386_p4 = scmp.lt.s32.totalorder (!%p336_p2), %s1415_s17, 15  ;;  %v413_v4 = vunpack.c.l.s4 (!%p336_p2), %v1572_v3  ;;  %1487 = vmatprep.subr.mxu1 (!%p336_p2), %v1573_v5  ;;  %v549_v6 = vld [vmem:[%s1864_s4] sm:$0xff] (!%p336_p2)  ;;  %v550_v7 = vld [vmem:[%s1864_s4 + $0x8] sm:$0xff] (!%p336_p2)  ;;  %vm1574_vm0 = vmmov (!%p336_p2), 0   ;;  %vm540_vm1 = vcmask (!%p336_p2), 64512  }
   0x9   : > { %v1654_v8 = vshrl.u32 (!%p336_p2), %v415_v1, 7  ;;  %1488 = vmatpush3.msra.mxu1 (!%p336_p2), %v681_v2  ;;  %1489 = vmatprep.mubr.msk.f32.mxu1 (!%p336_p2), %vm1574_vm0, %v1573_v5  ;;  %v1520_v9 = vpack.c.bf16 (!%p336_p2), %v550_v7, %v549_v6  ;;  %s1575_s11 = smov (!%p336_p2), 8   ;;  %v867_v51 = vld [vmem:[%s1866_s6] sm:$0xff] (!%p336_p2)  ;;  %v868_v52 = vld [vmem:[%s1866_s6 + $0x8] sm:$0xff] (!%p336_p2)  ;;  %v869_v53 = vld [vmem:[%s1866_s6 + $0x10] sm:$0xff] (!%p336_p2)  ;;  %vm551_vm2 = vcmask (!%p336_p2), 130048  }
   0xa   : > { %v414_v10 = vunpack.c.0.s8 (!%p336_p2), %v413_v4  ;;  %v1524_v54 = vpack.c.bf16 (!%p336_p2), %v868_v52, %v867_v51  ;;  %v870_v55 = vld [vmem:[%s1866_s6 + $0x18] sm:$0xff] (!%p336_p2)  ;;  %v871_v57 = vld [vmem:[%s1866_s6 + $0x20] sm:$0xff] (!%p336_p2)  ;;  %v872_v58 = vld [vmem:[%s1866_s6 + $0x28] sm:$0xff] (!%p336_p2)  ;;  %vm882_vm3 = vcmask (!%p336_p2), 523264   ;;  %vm1035_vm4 = vcmask (!%p336_p2), 261120  }
   0xb   : > { %1521 = vmatprep.subr.bf16.mxu0 (!%p336_p2), %v1520_v9  ;;  %v1677_v14 = vsub.s32 (!%p336_p2), 0, %v1654_v8  ;;  %v1528_v56 = vpack.c.bf16 (!%p336_p2), %v870_v55, %v869_v53  ;;  %v1532_v59 = vpack.c.bf16 (!%p336_p2), %v872_v58, %v871_v57  ;;  %vm1316_vm13 = vcmask (!%p336_p2), 1041409  }
   0xc   : > { %v1666_v11 = vsub.s32 (!%p336_p2), %v414_v10, %v1654_v8  ;;  %1523 = vmatpush3.bf16.msra.mxu0 (!%p336_p2), %v1520_v9  ;;  %1540 = vmatprep.subr.bf16.mxu1 (!%p336_p2), %v1524_v54  ;;  %vm1318_vm14 = vcmask (!%p336_p2), 1042434   ;;  %vm1320_vm15 = vcmask (!%p336_p2), 1043459   ;;  %vm1322_vm0 = vcmask (!%p336_p2), 1044484  }
   0xd   : > { %1525 = vmatprep.subr.bf16.mxu0 (!%p336_p2), %v1524_v54 }
   0xf   : > { %s1872_s16 = smov (!%p381_p3, %s1409_s16), 1  ;;  %s1874_s17 = smov (!%p386_p4, %s1415_s17), 15 }
  0x10   : > { %s1414_s23 = sshll.u32 %s1872_s16, 3  ;;  %s1416_s27 = sshll.u32 %s1874_s17, 3 }
  0x11   : > { %s384_s26 = scalar_lea.vmem %s1860_s0, %s1414_s23  ;;  %s1673_s30 = scalar_lea.vmem %s1861_s1, %s1416_s27 }
  0x12   : > { %v401_v12 = vld [vmem:[%s384_s26] sm:$0xff]  ;;  %v1689_v24 = vld [vmem:[%s1673_s30 + $0x10] sm:$0xff]  ;;  %v1692_v25 = vld [vmem:[%s1673_s30 + $0x8] sm:$0xff]  ;;  %s1818_s22 = scalar_lea.vmem %s1862_s2, %s1416_s27  ;;  %s400_s24 = scalar_lea.vmem %s1870_s10, %s1414_s23 }
  0x13   : > { %v418_v13 = vrot.slane %v401_v12, %v1666_v11  ;;  %v411_v15 = vcombine.high %v401_v12, %v401_v12  ;;  %1490 = vmatmul.mubr.msk.f32.vlgmr.msra.gmra.mrb[0].mxu1 %vm540_vm1, %v401_v12  ;;  %v1683_v19 = vld [vmem:[%s1673_s30] sm:$0xff]  ;;  %v1698_v31 = vld [vmem:[%s1673_s30 + $0x18] sm:$0xff]  ;;  %v1711_v42 = vld [vmem:[%s1673_s30 + $0x28] sm:$0xff] }
  0x14   : > { %v1706_v38 = vld [vmem:[%s1673_s30 + $0x20] sm:$0xff]  ;;  %v1716_v45 = vld [vmem:[%s1673_s30 + $0x30] sm:$0xff]  ;;  %v1721_v48 = vld [vmem:[%s1673_s30 + $0x38] sm:$0xff]  ;;  %1544 = vmatpush3.bf16.msra.mxu1 %v1524_v54 }
  0x15   : > { %v434_v16 = vrot.slane %v418_v13, %v1666_v11  ;;  %v426_v17 = vcombine.high %v418_v13, %v418_v13  ;;  %v425_v18 = vrot.slane %v411_v15, %v1666_v11  ;;  %1541 = vmatprep.subr.bf16.mxu1 %v1528_v56 }
  0x17   : > { %v463_v20 = vrot.slane %v434_v16, %v1677_v14  ;;  %v456_v21 = vcombine.high %v434_v16, %v434_v16  ;;  %v448_v22 = vrot.slane %v426_v17, %v1666_v11  ;;  %v441_v23 = vrot.slane %v425_v18, %v1666_v11  ;;  %v873_v16 = vld [vmem:[%s1866_s6 + $0x30] sm:$0xff]  ;;  %v874_v17 = vld [vmem:[%s1866_s6 + $0x38] sm:$0xff] }
  0x18   : > { %v427_v26 = vcombine.high %v425_v18, %v425_v18  ;;  %1545 = vmatpush3.bf16.msra.mxu1 %v1528_v56 }
  0x19   : > { %v500_v27 = vmul.f32 %v463_v20, %v1683_v19  ;;  %v471_v28 = vrot.slane %v456_v21, %v1677_v14  ;;  %v467_v29 = vrot.slane %v448_v22, %v1677_v14  ;;  %v458_v30 = vcombine.high %v448_v22, %v448_v22  ;;  %1542 = vmatprep.subr.bf16.mxu1 %v1532_v59  ;;  %v1428_v21 = vld [vmem:[%s1865_s5] ss:$0 sm:$0xff] }
  0x1a   : > { %v479_v32 = vrot.slane %v441_v23, %v1677_v14  ;;  %v455_v33 = vrot.slane %v427_v26, %v1666_v11  ;;  %v457_v37 = vcombine.high %v441_v23, %v441_v23  ;;  %v1536_v20 = vpack.c.bf16 %v874_v17, %v873_v16  ;;  %v1439_v17 = vld [vmem:[%s1868_s8] ss:$0 sm:$0xff] }
  0x1b   : > { %516 = vrot.lane.b32.xlu0 %v500_v27, %s1575_s11  ;;  %v502_v34 = vmul.f32 %v471_v28, %v1689_v24  ;;  %v501_v35 = vmul.f32 %v467_v29, %v1692_v25  ;;  %v475_v36 = vrot.slane %v458_v30, %v1677_v14 }
  0x1c   : > { %v483_v40 = vrot.slane %v455_v33, %v1677_v14  ;;  %v459_v41 = vcombine.high %v455_v33, %v455_v33  ;;  %v504_v43 = vmul.f32 %v479_v32, %v1706_v38  ;;  %v487_v44 = vrot.slane %v457_v37, %v1677_v14  ;;  %1546 = vmatpush3.bf16.msra.mxu1 %v1532_v59 }
  0x1d   : > { %520 = vrot.lane.b32.xlu1 %v502_v34, %s1575_s11  ;;  %v503_v39 = vmul.f32 %v475_v36, %v1698_v31  ;;  %1543 = vmatprep.subr.bf16.mxu1 %v1536_v20 }
  0x1e   : > { %v505_v46 = vmul.f32 %v483_v40, %v1711_v42  ;;  %v491_v47 = vrot.slane %v459_v41, %v1677_v14  ;;  %v506_v49 = vmul.f32 %v487_v44, %v1716_v45 }
  0x1f   : > { %518 = vrot.lane.b32.xlu0 %v501_v35, %s1575_s11 }
  0x20   : > { %v507_v50 = vmul.f32 %v491_v47, %v1721_v48  ;;  %1547 = vmatpush3.bf16.msra.mxu1 %v1536_v20 }
  0x21   : > { %522 = vrot.lane.b32.xlu1 %v503_v39, %s1575_s11 }
  0x23   : > { %524 = vrot.lane.b32.xlu0 %v504_v43, %s1575_s11 }
  0x25   : > { %526 = vrot.lane.b32.xlu1 %v505_v46, %s1575_s11 }
  0x27   : > { %528 = vrot.lane.b32.xlu0 %v506_v49, %s1575_s11 }
  0x29   : > { %530 = vrot.lane.b32.xlu1 %v507_v50, %s1575_s11 }
  0x8d   : > { %v517_v60 = vpop.permute.xlu0 %516 }
  0x8e   : > { %v541_v61 = vsel %vm540_vm1, %v1683_v19, %v517_v60 }
  0x8f   : > { %1475 = vmatprep.mubr.msk.f32.mxu0 %vm551_vm2, %v541_v61  ;;  %v521_v62 = vpop.permute.xlu1 %520 }
  0x90   : > { %v543_v63 = vsel %vm540_vm1, %v1689_v24, %v521_v62 }
  0x91   : > { %v519_v0 = vpop.permute.xlu0 %518 }
  0x92   : > { %v542_v1 = vsel %vm540_vm1, %v1692_v25, %v519_v0 }
  0x93   : > { %1476 = vmatmul.mubr.msk.f32.vlgmr.msra.gmra.mrb[0].mxu0 %vm551_vm2, %v542_v1  ;;  %v523_v2 = vpop.permute.xlu1 %522 }
  0x94   : > { %1478 = vmatprep.mubr.msk.f32.mxu0 %vm551_vm2, %v543_v63  ;;  %v544_v3 = vsel %vm540_vm1, %v1698_v31, %v523_v2  ;;  %1527 = vmatpush3.bf16.msra.mxu0 %v1524_v54 }
  0x95   : > { %v525_v4 = vpop.permute.xlu0 %524  ;;  %1529 = vmatprep.subr.bf16.mxu0 %v1528_v56 }
  0x96   : > { %v545_v5 = vsel %vm540_vm1, %v1706_v38, %v525_v4 }
  0x97   : > { %1479 = vmatmul.mubr.msk.f32.gmra.mrb[2].mxu0 %vm551_vm2, %v544_v3  ;;  %v527_v6 = vpop.permute.xlu1 %526 }
  0x98   : > { %v546_v7 = vsel %vm540_vm1, %v1711_v42, %v527_v6  ;;  %1481 = vmatprep.mubr.msk.f32.mxu0 %vm551_vm2, %v545_v5  ;;  %1531 = vmatpush3.bf16.msra.mxu0 %v1528_v56 }
  0x99   : > { %v529_v9 = vpop.permute.xlu0 %528  ;;  %1533 = vmatprep.subr.bf16.mxu0 %v1532_v59 }
  0x9a   : > { %v547_v10 = vsel %vm540_vm1, %v1716_v45, %v529_v9 }
  0x9b   : > { %1482 = vmatmul.mubr.msk.f32.gmra.mrb[4].mxu0 %vm551_vm2, %v546_v7  ;;  %v531_v12 = vpop.permute.xlu1 %530 }
  0x9c   : > { %v548_v13 = vsel %vm540_vm1, %v1721_v48, %v531_v12  ;;  %1484 = vmatprep.mubr.msk.f32.mxu0 %vm551_vm2, %v547_v10  ;;  %1535 = vmatpush3.bf16.msra.mxu0 %v1532_v59  ;;  %v1430_v12 = vld [vmem:[%s1867_s7] ss:$0 sm:$0xff] }
  0x9d   : > { %1537 = vmatprep.subr.bf16.mxu0 %v1536_v20 }
  0x9f   : > { %1485 = vmatmul.mubr.msk.f32.gmra.mrb[6].mxu0 %vm551_vm2, %v548_v13  ;;  %vm1324_vm2 = vcmask 1045509  }
  0xa0   : > { %1539 = vmatpush3.bf16.msra.mxu0 %v1536_v20 }
  0xe6   : > { %v757_v15 = vpop.f32.mrb[0].mxu1 }
  0xe7   : > { %v1491_v18 = vpop.f32.mrb[1].mxu1  ;;  %v758_v22 = vadd.f32 %v1428_v21, %v757_v15 }
  0xe9   : > { %v769_v23 = vrot.slane %v758_v22, %v1666_v11  ;;  %v762_v27 = vcombine.high %v758_v22, %v758_v22 }
  0xeb   : > { %v777_v26 = vcombine.high %v769_v23, %v769_v23  ;;  %v785_v29 = vrot.slane %v769_v23, %v1666_v11  ;;  %v776_v30 = vrot.slane %v762_v27, %v1666_v11 }
  0xed   : > { %v799_v28 = vrot.slane %v777_v26, %v1666_v11  ;;  %v814_v34 = vrot.slane %v785_v29, %v1677_v14  ;;  %v778_v35 = vcombine.high %v776_v30, %v776_v30  ;;  %v807_v37 = vcombine.high %v785_v29, %v785_v29 }
  0xee   : > { %v792_v50 = vrot.slane %v776_v30, %v1666_v11 }
  0xef   : > { %v818_v32 = vrot.slane %v799_v28, %v1677_v14  ;;  %v809_v33 = vcombine.high %v799_v28, %v799_v28  ;;  %v806_v44 = vrot.slane %v778_v35, %v1666_v11  ;;  %v822_v49 = vrot.slane %v807_v37, %v1677_v14 }
  0xf0   : > { %v830_v59 = vrot.slane %v792_v50, %v1677_v14  ;;  %v808_v60 = vcombine.high %v792_v50, %v792_v50 }
  0xf1   : > { %v826_v41 = vrot.slane %v809_v33, %v1677_v14  ;;  %v834_v55 = vrot.slane %v806_v44, %v1677_v14  ;;  %v810_v56 = vcombine.high %v806_v44, %v806_v44 }
  0xf2   : > { %v838_v3 = vrot.slane %v808_v60, %v1677_v14 }
  0xf3   : > { %v842_v0 = vrot.slane %v810_v56, %v1677_v14 }
 0x166   : > { %v1477_v36 = vpop.f32.mrb[0].mxu0 }
 0x167   : > { %v852_v39 = vadd.f32 %v1477_v36, %v818_v32  ;;  %v642_v40 = vpop.f32.mrb[1].mxu0 }
 0x168   : > { %v851_v43 = vadd.f32 %v814_v34, %v642_v40 }
 0x169   : > { %v860_v51 = vmax.f32 %v852_v39, 0.0 }
 0x16a   : > { %v859_v46 = vmax.f32 %v851_v43, 0.0  ;;  %v1480_v47 = vpop.f32.mrb[2].mxu0 }
 0x16b   : > { %v854_v52 = vadd.f32 %v1480_v47, %v826_v41  ;;  %v652_v53 = vpop.f32.mrb[3].mxu0 }
 0x16c   : > { %v853_v54 = vadd.f32 %v822_v49, %v652_v53  ;;  %1508 = vmatprep.mubr.msk.f32.mxu0 %vm882_vm3, %v859_v46 }
 0x16d   : > { %1509 = vmatmul.mubr.msk.f32.vlgmr.msra.gmra.mrb[8].mxu0 %vm882_vm3, %v860_v51  ;;  %v862_v61 = vmax.f32 %v854_v52, 0.0 }
 0x16e   : > { %v861_v57 = vmax.f32 %v853_v54, 0.0  ;;  %v1483_v58 = vpop.f32.mrb[4].mxu0 }
 0x16f   : > { %v856_v62 = vadd.f32 %v1483_v58, %v834_v55  ;;  %v662_v63 = vpop.f32.mrb[5].mxu0 }
 0x170   : > { %v855_v11 = vadd.f32 %v830_v59, %v662_v63  ;;  %1511 = vmatprep.mubr.msk.f32.mxu1 %vm882_vm3, %v861_v57  ;;  %v1077_v63 = vadd.s32 8, %v1654_v8 }
 0x171   : > { %1512 = vmatmul.mubr.msk.f32.vlgmr.msra.gmra.mrb[2].mxu1 %vm882_vm3, %v862_v61  ;;  %v864_v4 = vmax.f32 %v856_v62, 0.0  ;;  %v1576_v62 = vmov 0  }
 0x172   : > { %v863_v1 = vmax.f32 %v855_v11, 0.0  ;;  %v1486_v2 = vpop.f32.mrb[6].mxu0  ;;  %1562 = vset.pattern.permute.xlu0 %v1576_v62  ;;  %1561 = vset.pattern.permute.xlu1 %v1576_v62  ;;  %v1095_v11 = vand.u32 7, %v1077_v63 }
 0x173   : > { %v858_v5 = vadd.f32 %v1486_v2, %v842_v0  ;;  %v672_v6 = vpop.f32.mrb[7].mxu0  ;;  %v1181_v0 = vld [vmem:[%s1818_s22 + $0x8] sm:$0xff]  ;;  %v1079_v2 = vadd.s32 24, %v1654_v8 }
 0x174   : > { %v857_v7 = vadd.f32 %v838_v3, %v672_v6  ;;  %1514 = vmatprep.mubr.msk.f32.mxu1 %vm882_vm3, %v863_v1  ;;  %v1088_v1 = vand.u32 7, %v1654_v8  ;;  %v1440_v3 = vld [vmem:[#allocation2] ss:$0 sm:$0xff]  ;;  %vm1189_vm5 = vcmp.lt.s32.totalorder %v1095_v11, %v1181_v0 }
 0x175   : > { %1515 = vmatmul.mubr.msk.f32.gmra.mrb[4].mxu1 %vm882_vm3, %v864_v4  ;;  %v866_v10 = vmax.f32 %v858_v5, 0.0  ;;  %v1180_v4 = vld [vmem:[%s1818_s22] sm:$0xff] }
 0x176   : > { %v865_v9 = vmax.f32 %v857_v7, 0.0  ;;  %vm1188_vm6 = vcmp.lt.s32.totalorder %v1088_v1, %v1180_v4 }
 0x178   : > { %1517 = vmatprep.mubr.msk.f32.mxu1 %vm882_vm3, %v865_v9  ;;  %v1109_v9 = vand.u32 7, %v1079_v2 }
 0x179   : > { %1518 = vmatmul.mubr.msk.f32.gmra.mrb[6].mxu1 %vm882_vm3, %v866_v10  ;;  %v1078_v10 = vadd.s32 16, %v1654_v8  ;;  %vm1326_vm3 = vcmask 1046534  }
 0x240   : > { %v1510_v13 = vpop.f32.mrb[8].mxu0 }
 0x241   : > { %v979_v14 = vadd.f32 %v1510_v13, %v1430_v12  ;;  %v973_v15 = vpop.f32.mrb[9].mxu0  ;;  %v1183_v13 = vld [vmem:[%s1818_s22 + $0x18] sm:$0xff] }
 0x242   : > { %v974_v16 = vadd.f32 %v1430_v12, %v973_v15  ;;  %vm1191_vm7 = vcmp.lt.s32.totalorder %v1109_v9, %v1183_v13 }
 0x243   : > { %v1013_v18 = vmax.f32 %v979_v14, 0.0 }
 0x244   : > { %v1012_v20 = vmax.f32 %v974_v16, 0.0  ;;  %v1513_v21 = vpop.f32.mrb[2].mxu1 }
 0x245   : > { %v989_v22 = vadd.f32 %v1513_v21, %v1430_v12  ;;  %v983_v23 = vpop.f32.mrb[3].mxu1  ;;  %v1028_v26 = vmul.f32 %v1439_v17, %v1013_v18  ;;  %v1081_v18 = vadd.s32 40, %v1654_v8  ;;  %v1182_v21 = vld [vmem:[%s1818_s22 + $0x10] sm:$0xff] }
 0x246   : > { %v984_v27 = vadd.f32 %v1430_v12, %v983_v23  ;;  %v1027_v28 = vmul.f32 %v1439_v17, %v1012_v20 }
 0x247   : > { %v1015_v29 = vmax.f32 %v989_v22, 0.0  ;;  %v1039_v30 = vsel %vm1035_vm4, %v1028_v26, 0.0  ;;  %v1123_v26 = vand.u32 7, %v1081_v18 }
 0x248   : > { %v1014_v32 = vmax.f32 %v984_v27, 0.0  ;;  %v1516_v33 = vpop.f32.mrb[4].mxu1  ;;  %1040 = vadd.xlane.f32.xlu1 %v1039_v30  ;;  %v1036_v34 = vsel %vm1035_vm4, %v1027_v28, 0.0  ;;  %v1080_v27 = vadd.s32 32, %v1654_v8 }
 0x249   : > { %v999_v35 = vadd.f32 %v1516_v33, %v1430_v12  ;;  %v993_v36 = vpop.f32.mrb[5].mxu1  ;;  %1037 = vadd.xlane.f32.xlu0 %v1036_v34  ;;  %v1030_v37 = vmul.f32 %v1439_v17, %v1015_v29  ;;  %v1185_v29 = vld [vmem:[%s1818_s22 + $0x28] sm:$0xff] }
 0x24a   : > { %v994_v39 = vadd.f32 %v1430_v12, %v993_v36  ;;  %v1029_v41 = vmul.f32 %v1439_v17, %v1014_v32  ;;  %vm1193_vm9 = vcmp.lt.s32.totalorder %v1123_v26, %v1185_v29  ;;  %v1116_v34 = vand.u32 7, %v1080_v27 }
 0x24b   : > { %v1045_v40 = vsel %vm1035_vm4, %v1030_v37, 0.0  ;;  %v1017_v43 = vmax.f32 %v999_v35, 0.0  ;;  %v1082_v35 = vadd.s32 48, %v1654_v8  ;;  %v1184_v37 = vld [vmem:[%s1818_s22 + $0x20] sm:$0xff] }
 0x24c   : > { %v1016_v44 = vmax.f32 %v994_v39, 0.0  ;;  %v1519_v46 = vpop.f32.mrb[6].mxu1  ;;  %v1042_v52 = vsel %vm1035_vm4, %v1029_v41, 0.0  ;;  %vm1192_vm10 = vcmp.lt.s32.totalorder %v1116_v34, %v1184_v37 }
 0x24d   : > { %v1009_v47 = vadd.f32 %v1519_v46, %v1430_v12  ;;  %1046 = vadd.xlane.f32.xlu0 %v1045_v40  ;;  %v1003_v49 = vpop.f32.mrb[7].mxu1  ;;  %v1032_v56 = vmul.f32 %v1439_v17, %v1017_v43  ;;  %v1130_v43 = vand.u32 7, %v1082_v35  ;;  %v1186_v46 = vld [vmem:[%s1818_s22 + $0x30] sm:$0xff] }
 0x24e   : > { %v1004_v50 = vadd.f32 %v1430_v12, %v1003_v49  ;;  %v1031_v51 = vmul.f32 %v1439_v17, %v1016_v44  ;;  %v1083_v44 = vadd.s32 56, %v1654_v8 }
 0x24f   : > { %v1019_v53 = vmax.f32 %v1009_v47, 0.0  ;;  %v1051_v58 = vsel %vm1035_vm4, %v1032_v56, 0.0  ;;  %vm1194_vm11 = vcmp.lt.s32.totalorder %v1130_v43, %v1186_v46 }
 0x250   : > { %v1018_v54 = vmax.f32 %v1004_v50, 0.0  ;;  %v1048_v55 = vsel %vm1035_vm4, %v1031_v51, 0.0  ;;  %v1137_v51 = vand.u32 7, %v1083_v44 }
 0x251   : > { %1049 = vadd.xlane.f32.xlu1 %v1048_v55  ;;  %1043 = vadd.xlane.f32.xlu0 %v1042_v52  ;;  %v1034_v60 = vmul.f32 %v1439_v17, %v1019_v53  ;;  %v1187_v52 = vld [vmem:[%s1818_s22 + $0x38] sm:$0xff] }
 0x252   : > { %v1033_v57 = vmul.f32 %v1439_v17, %v1018_v54  ;;  %v1102_v17 = vand.u32 7, %v1078_v10  ;;  %vm1195_vm12 = vcmp.lt.s32.totalorder %v1137_v51, %v1187_v52 }
 0x253   : > { %v1057_v61 = vsel %vm1035_vm4, %v1034_v60, 0.0 }
 0x254   : > { %v1054_v59 = vsel %vm1035_vm4, %v1033_v57, 0.0  ;;  %vm1190_vm8 = vcmp.lt.s32.totalorder %v1102_v17, %v1182_v21  ;;  %vm1328_vm4 = vcmask 1047559  }
 0x255   : > { %1052 = vadd.xlane.f32.xlu0 %v1051_v58  ;;  %1055 = vadd.xlane.f32.xlu1 %v1054_v59 }
 0x259   : > { %1058 = vadd.xlane.f32.xlu0 %v1057_v61 }
 0x2d5   : > { %v1041_v5 = vpop.xlane.xlu1 %1040 }
 0x2d6   : > { %v1068_v6 = vadd.f32 %v1440_v3, %v1041_v5  ;;  %v1038_v7 = vpop.xlane.xlu0 %1037 }
 0x2d7   : > { %v1067_v12 = vadd.f32 %v1440_v3, %v1038_v7 }
 0x2d8   : > { %v1197_v14 = vsel %vm1189_vm5, %v1068_v6, 0.0 }
 0x2d9   : > { %1211 = vperm.xlu0 %1562, %v1197_v14   ;;  %v1196_v15 = vsel %vm1188_vm6, %v1067_v12, 0.0 }
 0x2da   : > { %v1047_v16 = vpop.xlane.xlu0 %1046  ;;  %1206 = vperm.xlu1 %1561, %v1196_v15  }
 0x2db   : > { %v1070_v20 = vadd.f32 %v1440_v3, %v1047_v16 }
 0x2dd   : > { %v1199_v22 = vsel %vm1191_vm7, %v1070_v20, 0.0 }
 0x2de   : > { %v1044_v23 = vpop.xlane.xlu0 %1043  ;;  %1221 = vperm.xlu1 %1561, %v1199_v22   ;;  %v1050_v30 = vpop.xlane.xlu1 %1049 }
 0x2df   : > { %v1069_v28 = vadd.f32 %v1440_v3, %v1044_v23  ;;  %v1071_v39 = vadd.f32 %v1440_v3, %v1050_v30 }
 0x2e1   : > { %v1198_v32 = vsel %vm1190_vm8, %v1069_v28, 0.0  ;;  %v1200_v49 = vsel %vm1192_vm10, %v1071_v39, 0.0 }
 0x2e2   : > { %v1053_v33 = vpop.xlane.xlu0 %1052  ;;  %1216 = vperm.xlu1 %1561, %v1198_v32   ;;  %v1056_v41 = vpop.xlane.xlu1 %1055 }
 0x2e3   : > { %v1072_v36 = vadd.f32 %v1440_v3, %v1053_v33  ;;  %v1073_v47 = vadd.f32 %v1440_v3, %v1056_v41 }
 0x2e5   : > { %v1201_v40 = vsel %vm1193_vm9, %v1072_v36, 0.0  ;;  %v1202_v54 = vsel %vm1194_vm11, %v1073_v47, 0.0 }
 0x2e6   : > { %1231 = vperm.xlu1 %1561, %v1201_v40   ;;  %v1059_v50 = vpop.xlane.xlu0 %1058 }
 0x2e7   : > { %v1074_v53 = vadd.f32 %v1440_v3, %v1059_v50 }
 0x2e9   : > { %v1203_v55 = vsel %vm1195_vm12, %v1074_v53, 0.0 }
 0x2ea   : > { %1226 = vperm.xlu1 %1561, %v1200_v49  }
 0x2ee   : > { %1236 = vperm.xlu1 %1561, %v1202_v54  }
 0x2f2   : > { %1241 = vperm.xlu1 %1561, %v1203_v55  }
 0x358   : > { %v1212_v56 = vpop.permute.xlu0 %1211 }
 0x359   : > { %v1245_v57 = vmul.f32 %v1212_v56, %v1692_v25  ;;  %v1207_v58 = vpop.permute.xlu1 %1206 }
 0x35a   : > { %v1244_v8 = vmul.f32 %v1207_v58, %v1683_v19 }
 0x35b   : > { %v1259_v59 = vsel %vm540_vm1, %v1245_v57, 0.0 }
 0x35c   : > { %v1252_v60 = vsel %vm540_vm1, %v1244_v8, 0.0  ;;  %v1260_v63 = vrot.slane %v1259_v59, 4 }
 0x35d   : > { %v1222_v61 = vpop.permute.xlu1 %1221  ;;  %v1253_v11 = vrot.slane %v1252_v60, 4 }
 0x35e   : > { %v1247_v62 = vmul.f32 %v1222_v61, %v1698_v31  ;;  %v1261_v3 = vadd.f32 %v1260_v63, %v1259_v59 }
 0x35f   : > { %v1254_v4 = vadd.f32 %v1253_v11, %v1252_v60 }
 0x360   : > { %v1273_v0 = vsel %vm540_vm1, %v1247_v62, 0.0  ;;  %v1262_v9 = vrot.slane %v1261_v3, 2 }
 0x361   : > { %v1217_v1 = vpop.permute.xlu1 %1216  ;;  %v1274_v25 = vrot.slane %v1273_v0, 4  ;;  %v1255_v10 = vrot.slane %v1254_v4, 2 }
 0x362   : > { %v1246_v2 = vmul.f32 %v1217_v1, %v1689_v24  ;;  %v1263_v17 = vadd.f32 %v1262_v9, %v1261_v3 }
 0x363   : > { %v1275_v31 = vadd.f32 %v1274_v25, %v1273_v0  ;;  %v1256_v18 = vadd.f32 %v1255_v10, %v1254_v4 }
 0x364   : > { %v1266_v5 = vsel %vm540_vm1, %v1246_v2, 0.0  ;;  %v1264_v28 = vrot.slane %v1263_v17, 1 }
 0x365   : > { %v1267_v19 = vrot.slane %v1266_v5, 4  ;;  %v1232_v6 = vpop.permute.xlu1 %1231  ;;  %v1276_v20 = vrot.slane %v1275_v31, 2  ;;  %v1257_v29 = vrot.slane %v1256_v18, 1 }
 0x366   : > { %v1249_v7 = vmul.f32 %v1232_v6, %v1711_v42  ;;  %v1265_v40 = vadd.f32 %v1264_v28, %v1263_v17 }
 0x367   : > { %v1268_v12 = vadd.f32 %v1267_v19, %v1266_v5  ;;  %v1277_v32 = vadd.f32 %v1276_v20, %v1275_v31  ;;  %v1258_v41 = vadd.f32 %v1257_v29, %v1256_v18 }
 0x368   : > { %v1287_v13 = vsel %vm540_vm1, %v1249_v7, 0.0 }
 0x369   : > { %v1269_v14 = vrot.slane %v1268_v12, 2  ;;  %v1288_v15 = vrot.slane %v1287_v13, 4  ;;  %v1227_v16 = vpop.permute.xlu1 %1226  ;;  %v1278_v46 = vrot.slane %v1277_v32, 1  ;;  %v1317_v53 = vsel %vm1316_vm13, %v1265_v40, %v1258_v41 }
 0x36a   : > { %v1248_v24 = vmul.f32 %v1227_v16, %v1706_v38 }
 0x36b   : > { %v1270_v21 = vadd.f32 %v1269_v14, %v1268_v12  ;;  %v1289_v23 = vadd.f32 %v1288_v15, %v1287_v13  ;;  %v1279_v57 = vadd.f32 %v1278_v46, %v1277_v32 }
 0x36c   : > { %v1280_v22 = vsel %vm540_vm1, %v1248_v24, 0.0 }
 0x36d   : > { %v1281_v26 = vrot.slane %v1280_v22, 4  ;;  %v1237_v42 = vpop.permute.xlu1 %1236  ;;  %v1271_v33 = vrot.slane %v1270_v21, 1  ;;  %v1290_v35 = vrot.slane %v1289_v23, 2 }
 0x36e   : > { %v1250_v27 = vmul.f32 %v1237_v42, %v1716_v45 }
 0x36f   : > { %v1282_v30 = vadd.f32 %v1281_v26, %v1280_v22  ;;  %v1272_v45 = vadd.f32 %v1271_v33, %v1270_v21  ;;  %v1291_v49 = vadd.f32 %v1290_v35, %v1289_v23 }
 0x370   : > { %v1294_v34 = vsel %vm540_vm1, %v1250_v27, 0.0 }
 0x371   : > { %v1283_v38 = vrot.slane %v1282_v30, 2  ;;  %v1295_v36 = vrot.slane %v1294_v34, 4  ;;  %v1242_v37 = vpop.permute.xlu1 %1241  ;;  %v1319_v56 = vsel %vm1318_vm14, %v1272_v45, %v1317_v53  ;;  %v1292_v58 = vrot.slane %v1291_v49, 1 }
 0x372   : > { %v1251_v39 = vmul.f32 %v1242_v37, %v1721_v48  ;;  %v1321_v60 = vsel %vm1320_vm15, %v1279_v57, %v1319_v56 }
 0x373   : > { %v1284_v43 = vadd.f32 %v1283_v38, %v1282_v30  ;;  %v1296_v44 = vadd.f32 %v1295_v36, %v1294_v34  ;;  %v1293_v11 = vadd.f32 %v1292_v58, %v1291_v49 }
 0x374   : > { %v1301_v47 = vsel %vm540_vm1, %v1251_v39, 0.0 }
 0x375   : > { %v1285_v50 = vrot.slane %v1284_v43, 1  ;;  %v1297_v51 = vrot.slane %v1296_v44, 2  ;;  %v1302_v52 = vrot.slane %v1301_v47, 4 }
 0x377   : > { %v1298_v54 = vadd.f32 %v1297_v51, %v1296_v44  ;;  %v1303_v55 = vadd.f32 %v1302_v52, %v1301_v47  ;;  %v1286_v48 = vadd.f32 %v1285_v50, %v1284_v43 }
 0x379   : > { %v1299_v8 = vrot.slane %v1298_v54, 1  ;;  %v1304_v59 = vrot.slane %v1303_v55, 2  ;;  %v1323_v62 = vsel %vm1322_vm0, %v1286_v48, %v1321_v60 }
 0x37a   : > { %v1325_v1 = vsel %vm1324_vm2, %v1293_v11, %v1323_v62 }
 0x37b   : > { %v1305_v61 = vadd.f32 %v1304_v59, %v1303_v55  ;;  %v1300_v63 = vadd.f32 %v1299_v8, %v1298_v54 }
 0x37d   : > { %v1306_v0 = vrot.slane %v1305_v61, 1  ;;  %v1327_v3 = vsel %vm1326_vm3, %v1300_v63, %v1325_v1 }
 0x37f   : > { %v1307_v2 = vadd.f32 %v1306_v0, %v1305_v61 }
 0x381   : > { %v1329_v4 = vsel %vm1328_vm4, %v1307_v2, %v1327_v3 }
 0x382   : > { %1331 = vst.msk [vmem:[%s400_s24] sm:$0xff] %vm540_vm1, %v1329_v4 }
 0x383 PF: > { %s22_s15 = sadd.s32 1, %s1570_s15  }
 0x384   : > { %p19_p5 = scmp.ge.s32.totalorder %s22_s15, 4  }
 0x386   :  { %21 = sbr.rel (!%p19_p5) target bundleno = 3 (0x3), region = 96 }

</bundles_post_ra>
